<compile_context>
chip_gen: v7x
topology: tpu7x:2x2x1
jax: 0.10.0
libtpu: 0.0.40
codegen_flags: <defaults>
</compile_context>

<pallas_src>
import jax
import jax.numpy as jnp
from jax.experimental import pallas as pl
from jax.experimental.pallas import tpu as pltpu


def _round_up(x, m):
    return ((x + m - 1) // m) * m


# ----------------------------------------------------------------------------- kernel
def _class_block_kernel(x_ref, w1_ref, b1_ref, w2_ref, b2_ref, out_ref, h_ref):
    """One (batch-tile i, class-tile j) step of the fused ClassBlock forward."""
    # Bottleneck Linear (BN pre-folded) + ReLU: computed once per batch tile (at the
    # first class tile) and cached in VMEM scratch for the remaining class tiles.
    @pl.when(pl.program_id(1) == 0)
    def _():
        x = x_ref[...].astype(jnp.bfloat16)                  # in-kernel bf16 cast
        h = jnp.dot(x, w1_ref[...], preferred_element_type=jnp.float32)
        h = jnp.maximum(h + b1_ref[...], 0.0)                # bias + ReLU (Dropout=id)
        h_ref[...] = h.astype(jnp.bfloat16)

    # Classifier Linear on the current class tile: [TB, NB]bf16 @ [NB, TC]bf16 -> f32.
    out = jnp.dot(h_ref[...], w2_ref[...], preferred_element_type=jnp.float32)
    out_ref[...] = (out + b2_ref[...]).astype(out_ref.dtype)


# --------------------------------------------------------------------- one-time prep
def prepare_class_block_params(params, *, eps=1e-5, tile_c_cap=2048):
    """One-time (cacheable) parameter prep. Do NOT call per forward pass.

    Folds eval-mode BatchNorm1d into the first Linear, zero-pads input_dim to a
    multiple of 128 and class_num to a multiple of tile_c, and casts the matmul
    operands to bf16 (biases stay f32).
    """
    w1, w2 = params["w1"], params["w2"]            # [D, NB], [NB, C]
    D, NB = w1.shape
    C = w2.shape[1]

    inv_std = jax.lax.rsqrt(params["rvar"] + eps)              # [1, NB]
    scale = params["gamma"] * inv_std                          # [1, NB]
    w1_fold = w1 * scale                                       # [D, NB]
    b1_fold = (params["b1"] - params["rmean"]) * scale + params["beta"]

    # Pad input dim (MXU contraction depth); zeros are numerically exact.
    D_pad = _round_up(D, 128)
    if D_pad != D:
        w1_fold = jnp.pad(w1_fold, ((0, D_pad - D), (0, 0)))

    # Pad class dim to a multiple of tile_c (lane-dense stores, streamable W2).
    tile_c = min(_round_up(C, 128), tile_c_cap)
    C_pad = _round_up(C, tile_c)
    b2 = params["b2"]
    if C_pad != C:
        w2 = jnp.pad(w2, ((0, 0), (0, C_pad - C)))
        b2 = jnp.pad(b2, ((0, 0), (0, C_pad - C)))

    return {
        "w1_bf": w1_fold.astype(jnp.bfloat16),     # [D_pad, NB]
        "b1_f32": b1_fold.astype(jnp.float32),     # [1, NB]
        "w2_bf": w2.astype(jnp.bfloat16),          # [NB, C_pad]
        "b2_f32": b2.astype(jnp.float32),          # [1, C_pad]
        "dims": (D, NB, C, D_pad, C_pad, tile_c),
    }


def _vmem_limit_bytes(need_bytes):
    """Generation-aware VMEM limit: <= 5/8 of physical VMEM (40 MiB on v7x's 64 MiB,
    64+ available headroom on v5e/v6e's 128 MiB), never below the 32 MiB default."""
    try:
        cap = pltpu.get_tpu_info().vmem_capacity_bytes
    except Exception:
        cap = 128 * 1024 * 1024
    return int(min(max(32 * 1024 * 1024, need_bytes + (8 << 20)), cap * 5 // 8))


# --------------------------------------------------------------------------- forward
def class_block_forward(x, prep, *, tile_b=None, out_dtype=jnp.float32):
    """ClassBlock eval-mode forward. `prep` comes from prepare_class_block_params()."""
    D, NB, C, D_pad, C_pad, tile_c = prep["dims"]
    B = x.shape[0]
    assert x.shape == (B, D), x.shape

    # Adaptive batch tiling: cap 512, prefer >= 2 tiles (v7x dual TensorCore) while
    # keeping padded dead rows under one sublane group.
    if tile_b is None:
        n_b = max(pl.cdiv(B, 512), 2 if B > 16 else 1)
        tile_b = _round_up(pl.cdiv(B, n_b), 16)
    tile_b = max(16, _round_up(tile_b, 16))
    B_pad = pl.cdiv(B, tile_b) * tile_b
    nb, nc = B_pad // tile_b, C_pad // tile_c

    # Single pad op for batch + feature dims; x stays f32 (cast to bf16 in-kernel).
    if B_pad != B or D_pad != D:
        x = jnp.pad(x, ((0, B_pad - B), (0, D_pad - D)))

    out_bytes = jnp.finfo(out_dtype).bits // 8
    cost = pl.CostEstimate(
        flops=2 * B_pad * (D_pad * NB + NB * C_pad),
        transcendentals=0,
        bytes_accessed=(B_pad * D_pad * 4 + D_pad * NB * 2 + NB * 4
                        + NB * C_pad * 2 + C_pad * 4 + B_pad * C_pad * out_bytes))

    # Conservative (all double-buffered) VMEM requirement for the limit hint.
    need = (2 * tile_b * D_pad * 4                      # x tiles (f32)
            + 2 * tile_b * tile_c * out_bytes           # out tiles
            + 2 * (D_pad * NB * 2 + NB * 4)             # W1 + b1
            + 2 * (NB * tile_c * 2 + tile_c * 4)        # W2 tile + b2 tile
            + tile_b * NB * 2)                          # cached h scratch (bf16)

    def run(single_buffer_resident):
        def resident(shape, imap):
            # Constant index_map -> no re-DMA after step 0; single-buffer to halve VMEM.
            if single_buffer_resident:
                return pl.BlockSpec(shape, imap, pipeline_mode=pl.Buffered(1))
            return pl.BlockSpec(shape, imap)

        # W2/b2 are only truly resident when there is a single class tile; otherwise
        # they stream over j and keep default double buffering to hide their DMA.
        if nc == 1:
            w2_spec = resident((NB, tile_c), lambda i, j: (0, j))
            b2_spec = resident((1, tile_c), lambda i, j: (0, j))
        else:
            w2_spec = pl.BlockSpec((NB, tile_c), lambda i, j: (0, j))
            b2_spec = pl.BlockSpec((1, tile_c), lambda i, j: (0, j))

        return pl.pallas_call(
            _class_block_kernel,
            out_shape=jax.ShapeDtypeStruct((B_pad, C_pad), out_dtype),
            grid_spec=pltpu.PrefetchScalarGridSpec(
                num_scalar_prefetch=0,
                grid=(nb, nc),
                in_specs=[
                    pl.BlockSpec((tile_b, D_pad), lambda i, j: (i, 0)),   # x (f32)
                    resident((D_pad, NB), lambda i, j: (0, 0)),           # folded W1 (bf16)
                    resident((1, NB), lambda i, j: (0, 0)),               # folded b1 (f32)
                    w2_spec,                                              # W2 tile (bf16)
                    b2_spec,                                              # b2 tile (f32)
                ],
                out_specs=pl.BlockSpec((tile_b, tile_c), lambda i, j: (i, j)),
                scratch_shapes=[pltpu.VMEM((tile_b, NB), jnp.bfloat16)],  # cached h
            ),
            compiler_params=pltpu.CompilerParams(
                dimension_semantics=("parallel", "arbitrary"),
                vmem_limit_bytes=_vmem_limit_bytes(need)),
            cost_estimate=cost,
        )(x, prep["w1_bf"], prep["b1_f32"], prep["w2_bf"], prep["b2_f32"])

    try:
        out = run(single_buffer_resident=True)
    except Exception:
        # pipeline_mode=pl.Buffered(1) unsupported on this JAX build; fall back to
        # default double-buffered resident weights (identical results, more VMEM).
        out = run(single_buffer_resident=False)

    return out[:B, :C]


# ------------------------------------------------------------------- init & reference
def init_class_block_params(key, input_dim, class_num, num_bottleneck=512):
    """Deterministic re-implementation of the PyTorch init functions."""
    k1, k2, k3 = jax.random.split(key, 3)

    # nn.Linear(input_dim, num_bottleneck) with kaiming_normal_(a=0, mode='fan_out'):
    # std = sqrt(2 / fan_out) = sqrt(2 / num_bottleneck); bias = 0.
    w1_std = (2.0 / num_bottleneck) ** 0.5
    w1 = jax.random.normal(k1, (num_bottleneck, input_dim), jnp.float32) * w1_std
    b1 = jnp.zeros((num_bottleneck,), jnp.float32)

    # BatchNorm1d: weight ~ N(1.0, 0.02), bias = 0, running stats (0, 1).
    gamma = 1.0 + 0.02 * jax.random.normal(k2, (num_bottleneck,), jnp.float32)
    beta = jnp.zeros((num_bottleneck,), jnp.float32)
    rmean = jnp.zeros((num_bottleneck,), jnp.float32)
    rvar = jnp.ones((num_bottleneck,), jnp.float32)

    # classifier nn.Linear(num_bottleneck, class_num): weight ~ N(0, 0.001), bias = 0.
    w2 = 0.001 * jax.random.normal(k3, (class_num, num_bottleneck), jnp.float32)
    b2 = jnp.zeros((class_num,), jnp.float32)

    # Pre-transpose weights to [in, out] (x @ W, MXU-friendly), 1-D vectors -> [1, N].
    return {
        "w1": w1.T,                       # [input_dim, num_bottleneck]
        "b1": b1[None, :],                # [1, num_bottleneck]
        "gamma": gamma[None, :],
        "beta": beta[None, :],
        "rmean": rmean[None, :],
        "rvar": rvar[None, :],
        "w2": w2.T,                       # [num_bottleneck, class_num]
        "b2": b2[None, :],                # [1, class_num]
    }


def class_block_reference(x, params, eps=1e-5):
    """Pure-JAX reference (explicit BN, f32) for verification."""
    h = x @ params["w1"] + params["b1"]
    h = (h - params["rmean"]) / jnp.sqrt(params["rvar"] + eps) * params["gamma"] + params["beta"]
    h = jnp.maximum(h, 0.0)
    return h @ params["w2"] + params["b2"]


if __name__ == "__main__":
    key = jax.random.PRNGKey(0)
    k_x, k_p = jax.random.split(key)

    B, input_dim, class_num, num_bottleneck = 8, 64, 16, 512
    x = jax.random.normal(k_x, (B, input_dim), jnp.float32)
    params = init_class_block_params(k_p, input_dim, class_num, num_bottleneck)

    # One-time param prep (BN fold + padding + bf16 cast), hoisted out of the forward.
    prep = prepare_class_block_params(params)

    out = class_block_forward(x, prep)
    out = jax.block_until_ready(out)

    ref = class_block_reference(x, params)
    assert out.shape == (B, class_num), out.shape
    # bf16 matmul operands with f32 accumulation: tolerance scaled to the logit
    # magnitude (classifier weights ~ N(0, 0.001) -> outputs O(0.01)).
    max_err = float(jnp.max(jnp.abs(out - ref)))
    tol = 1e-3 + 2e-2 * float(jnp.max(jnp.abs(ref)))
    assert max_err <= tol, (max_err, tol)

    print("KERNEL_OK")
</pallas_src>

<mosaic_0001>
module attributes {stable_mosaic.version = 11 : i64} {
  func.func @_class_block_kernel(%arg0: i32, %arg1: i32, %arg2: memref<16x128xf32, #tpu.memory_space<vmem>>, %arg3: memref<128x512xbf16, #tpu.memory_space<vmem>>, %arg4: memref<1x512xf32, #tpu.memory_space<vmem>>, %arg5: memref<512x128xbf16, #tpu.memory_space<vmem>>, %arg6: memref<1x128xf32, #tpu.memory_space<vmem>>, %arg7: memref<16x128xf32, #tpu.memory_space<vmem>>, %arg8: memref<16x512xbf16, #tpu.memory_space<vmem>>) attributes {dimension_semantics = [#tpu.dimension_semantics<parallel>, #tpu.dimension_semantics<arbitrary>], iteration_bounds = array<i64: 1, 1>, scalar_prefetch = 0 : i64, scratch_operands = 1 : i64, tpu.core_type = #tpu.core_type<tc>, window_params = [{transform_indices = @transform_0, window_bounds = array<i64: 16, 128>}, {pipeline_mode = #tpu.pipeline_mode<synchronous>, transform_indices = @transform_1, window_bounds = array<i64: 128, 512>}, {pipeline_mode = #tpu.pipeline_mode<synchronous>, transform_indices = @transform_2, window_bounds = array<i64: 1, 512>}, {pipeline_mode = #tpu.pipeline_mode<synchronous>, transform_indices = @transform_3, window_bounds = array<i64: 512, 128>}, {pipeline_mode = #tpu.pipeline_mode<synchronous>, transform_indices = @transform_4, window_bounds = array<i64: 1, 128>}, {transform_indices = @transform_5, window_bounds = array<i64: 16, 128>}]} {
    %c0_i32 = arith.constant 0 : i32
    %0 = arith.cmpi eq, %arg1, %c0_i32 : i32
    %1 = arith.extui %0 : i1 to i32
    %c0_i32_0 = arith.constant 0 : i32
    %2 = arith.cmpi ne, %1, %c0_i32_0 : i32
    scf.if %2 {
      %c0_8 = arith.constant 0 : index
      %c0_9 = arith.constant 0 : index
      %10 = vector.load %arg2[%c0_8, %c0_9] : memref<16x128xf32, #tpu.memory_space<vmem>>, vector<16x128xf32>
      %11 = arith.truncf %10 : vector<16x128xf32> to vector<16x128xbf16>
      %c0_10 = arith.constant 0 : index
      %c0_11 = arith.constant 0 : index
      %12 = vector.load %arg3[%c0_10, %c0_11] : memref<128x512xbf16, #tpu.memory_space<vmem>>, vector<128x512xbf16>
      %cst_12 = arith.constant dense<0.000000e+00> : vector<16x512xf32>
      %13 = tpu.matmul %11, %12, %cst_12 {dimension_numbers = #tpu.dot_dimension_numbers<[1], [0], [0], [1], [0, 0, 1, 1], [], []>} : vector<16x128xbf16>, vector<128x512xbf16>, vector<16x512xf32> -> vector<16x512xf32>
      %c0_13 = arith.constant 0 : index
      %c0_14 = arith.constant 0 : index
      %14 = vector.load %arg4[%c0_13, %c0_14] : memref<1x512xf32, #tpu.memory_space<vmem>>, vector<1x512xf32>
      %15 = vector.broadcast %14 : vector<1x512xf32> to vector<16x512xf32>
      %16 = arith.addf %13, %15 : vector<16x512xf32>
      %cst_15 = arith.constant 0.000000e+00 : f32
      %17 = vector.broadcast %cst_15 : f32 to vector<16x512xf32>
      %18 = arith.maximumf %16, %17 : vector<16x512xf32>
      %19 = arith.truncf %18 : vector<16x512xf32> to vector<16x512xbf16>
      %c0_16 = arith.constant 0 : index
      %c0_17 = arith.constant 0 : index
      %20 = vector.load %arg8[%c0_16, %c0_17] : memref<16x512xbf16, #tpu.memory_space<vmem>>, vector<16x512xbf16>
      tpu.vector_store %arg8[%c0_16, %c0_17], %19 {strides = array<i32>} : memref<16x512xbf16, #tpu.memory_space<vmem>>, vector<16x512xbf16>,
    } else {
    }
    %c0 = arith.constant 0 : index
    %c0_1 = arith.constant 0 : index
    %3 = vector.load %arg8[%c0, %c0_1] : memref<16x512xbf16, #tpu.memory_space<vmem>>, vector<16x512xbf16>
    %c0_2 = arith.constant 0 : index
    %c0_3 = arith.constant 0 : index
    %4 = vector.load %arg5[%c0_2, %c0_3] : memref<512x128xbf16, #tpu.memory_space<vmem>>, vector<512x128xbf16>
    %cst = arith.constant dense<0.000000e+00> : vector<16x128xf32>
    %5 = tpu.matmul %3, %4, %cst {dimension_numbers = #tpu.dot_dimension_numbers<[1], [0], [0], [1], [0, 0, 1, 1], [], []>} : vector<16x512xbf16>, vector<512x128xbf16>, vector<16x128xf32> -> vector<16x128xf32>
    %c0_4 = arith.constant 0 : index
    %c0_5 = arith.constant 0 : index
    %6 = vector.load %arg6[%c0_4, %c0_5] : memref<1x128xf32, #tpu.memory_space<vmem>>, vector<1x128xf32>
    %7 = vector.broadcast %6 : vector<1x128xf32> to vector<16x128xf32>
    %8 = arith.addf %5, %7 : vector<16x128xf32>
    %c0_6 = arith.constant 0 : index
    %c0_7 = arith.constant 0 : index
    %9 = vector.load %arg7[%c0_6, %c0_7] : memref<16x128xf32, #tpu.memory_space<vmem>>, vector<16x128xf32>
    tpu.vector_store %arg7[%c0_6, %c0_7], %8 {strides = array<i32>} : memref<16x128xf32, #tpu.memory_space<vmem>>, vector<16x128xf32>,
    return
  }
  func.func @transform_0(%arg0: i32, %arg1: i32) -> (i32, i32) {
    %c0_i32 = arith.constant 0 : i32
    %c0_i32_0 = arith.constant 0 : i32
    return %arg0, %c0_i32 : i32, i32
  }
  func.func @transform_1(%arg0: i32, %arg1: i32) -> (i32, i32) {
    %c0_i32 = arith.constant 0 : i32
    %c0_i32_0 = arith.constant 0 : i32
    %c0_i32_1 = arith.constant 0 : i32
    return %c0_i32, %c0_i32_0 : i32, i32
  }
  func.func @transform_2(%arg0: i32, %arg1: i32) -> (i32, i32) {
    %c0_i32 = arith.constant 0 : i32
    %c0_i32_0 = arith.constant 0 : i32
    %c0_i32_1 = arith.constant 0 : i32
    return %c0_i32, %c0_i32_0 : i32, i32
  }
  func.func @transform_3(%arg0: i32, %arg1: i32) -> (i32, i32) {
    %c0_i32 = arith.constant 0 : i32
    %c0_i32_0 = arith.constant 0 : i32
    return %c0_i32, %arg1 : i32, i32
  }
  func.func @transform_4(%arg0: i32, %arg1: i32) -> (i32, i32) {
    %c0_i32 = arith.constant 0 : i32
    %c0_i32_0 = arith.constant 0 : i32
    return %c0_i32, %arg1 : i32, i32
  }
  func.func @transform_5(%arg0: i32, %arg1: i32) -> (i32, i32) {
    %c0_i32 = arith.constant 0 : i32
    return %arg0, %arg1 : i32, i32
  }
}

module attributes {stable_mosaic.version = 11 : i64} {
  func.func @_class_block_kernel(%arg0: i32, %arg1: i32, %arg2: memref<16x128xf32, #tpu.memory_space<vmem>>, %arg3: memref<128x512xbf16, #tpu.memory_space<vmem>>, %arg4: memref<1x512xf32, #tpu.memory_space<vmem>>, %arg5: memref<512x128xbf16, #tpu.memory_space<vmem>>, %arg6: memref<1x128xf32, #tpu.memory_space<vmem>>, %arg7: memref<16x128xf32, #tpu.memory_space<vmem>>, %arg8: memref<16x512xbf16, #tpu.memory_space<vmem>>) attributes {dimension_semantics = [#tpu.dimension_semantics<parallel>, #tpu.dimension_semantics<arbitrary>], iteration_bounds = array<i64: 1, 1>, scalar_prefetch = 0 : i64, scratch_operands = 1 : i64, tpu.core_type = #tpu.core_type<tc>, window_params = [{transform_indices = @transform_0, window_bounds = array<i64: 16, 128>}, {pipeline_mode = #tpu.pipeline_mode<synchronous>, transform_indices = @transform_1, window_bounds = array<i64: 128, 512>}, {pipeline_mode = #tpu.pipeline_mode<synchronous>, transform_indices = @transform_2, window_bounds = array<i64: 1, 512>}, {transform_indices = @transform_3, window_bounds = array<i64: 512, 128>}, {transform_indices = @transform_4, window_bounds = array<i64: 1, 128>}, {transform_indices = @transform_5, window_bounds = array<i64: 16, 128>}]} {
    %c0_i32 = arith.constant 0 : i32
    %0 = arith.cmpi eq, %arg1, %c0_i32 : i32
    %1 = arith.extui %0 : i1 to i32
    %c0_i32_0 = arith.constant 0 : i32
    %2 = arith.cmpi ne, %1, %c0_i32_0 : i32
    scf.if %2 {
      %c0_8 = arith.constant 0 : index
      %c0_9 = arith.constant 0 : index
      %10 = vector.load %arg2[%c0_8, %c0_9] : memref<16x128xf32, #tpu.memory_space<vmem>>, vector<16x128xf32>
      %11 = arith.truncf %10 : vector<16x128xf32> to vector<16x128xbf16>
      %c0_10 = arith.constant 0 : index
      %c0_11 = arith.constant 0 : index
      %12 = vector.load %arg3[%c0_10, %c0_11] : memref<128x512xbf16, #tpu.memory_space<vmem>>, vector<128x512xbf16>
      %cst_12 = arith.constant dense<0.000000e+00> : vector<16x512xf32>
      %13 = tpu.matmul %11, %12, %cst_12 {dimension_numbers = #tpu.dot_dimension_numbers<[1], [0], [0], [1], [0, 0, 1, 1], [], []>} : vector<16x128xbf16>, vector<128x512xbf16>, vector<16x512xf32> -> vector<16x512xf32>
      %c0_13 = arith.constant 0 : index
      %c0_14 = arith.constant 0 : index
      %14 = vector.load %arg4[%c0_13, %c0_14] : memref<1x512xf32, #tpu.memory_space<vmem>>, vector<1x512xf32>
      %15 = vector.broadcast %14 : vector<1x512xf32> to vector<16x512xf32>
      %16 = arith.addf %13, %15 : vector<16x512xf32>
      %cst_15 = arith.constant 0.000000e+00 : f32
      %17 = vector.broadcast %cst_15 : f32 to vector<16x512xf32>
      %18 = arith.maximumf %16, %17 : vector<16x512xf32>
      %19 = arith.truncf %18 : vector<16x512xf32> to vector<16x512xbf16>
      %c0_16 = arith.constant 0 : index
      %c0_17 = arith.constant 0 : index
      %20 = vector.load %arg8[%c0_16, %c0_17] : memref<16x512xbf16, #tpu.memory_space<vmem>>, vector<16x512xbf16>
      tpu.vector_store %arg8[%c0_16, %c0_17], %19 {strides = array<i32>} : memref<16x512xbf16, #tpu.memory_space<vmem>>, vector<16x512xbf16>,
    } else {
    }
    %c0 = arith.constant 0 : index
    %c0_1 = arith.constant 0 : index
    %3 = vector.load %arg8[%c0, %c0_1] : memref<16x512xbf16, #tpu.memory_space<vmem>>, vector<16x512xbf16>
    %c0_2 = arith.constant 0 : index
    %c0_3 = arith.constant 0 : index
    %4 = vector.load %arg5[%c0_2, %c0_3] : memref<512x128xbf16, #tpu.memory_space<vmem>>, vector<512x128xbf16>
    %cst = arith.constant dense<0.000000e+00> : vector<16x128xf32>
    %5 = tpu.matmul %3, %4, %cst {dimension_numbers = #tpu.dot_dimension_numbers<[1], [0], [0], [1], [0, 0, 1, 1], [], []>} : vector<16x512xbf16>, vector<512x128xbf16>, vector<16x128xf32> -> vector<16x128xf32>
    %c0_4 = arith.constant 0 : index
    %c0_5 = arith.constant 0 : index
    %6 = vector.load %arg6[%c0_4, %c0_5] : memref<1x128xf32, #tpu.memory_space<vmem>>, vector<1x128xf32>
    %7 = vector.broadcast %6 : vector<1x128xf32> to vector<16x128xf32>
    %8 = arith.addf %5, %7 : vector<16x128xf32>
    %c0_6 = arith.constant 0 : index
    %c0_7 = arith.constant 0 : index
    %9 = vector.load %arg7[%c0_6, %c0_7] : memref<16x128xf32, #tpu.memory_space<vmem>>, vector<16x128xf32>
    tpu.vector_store %arg7[%c0_6, %c0_7], %8 {strides = array<i32>} : memref<16x128xf32, #tpu.memory_space<vmem>>, vector<16x128xf32>,
    return
  }
  func.func @transform_0(%arg0: i32, %arg1: i32) -> (i32, i32) {
    %c0_i32 = arith.constant 0 : i32
    %c0_i32_0 = arith.constant 0 : i32
    return %arg0, %c0_i32 : i32, i32
  }
  func.func @transform_1(%arg0: i32, %arg1: i32) -> (i32, i32) {
    %c0_i32 = arith.constant 0 : i32
    %c0_i32_0 = arith.constant 0 : i32
    %c0_i32_1 = arith.constant 0 : i32
    return %c0_i32, %c0_i32_0 : i32, i32
  }
  func.func @transform_2(%arg0: i32, %arg1: i32) -> (i32, i32) {
    %c0_i32 = arith.constant 0 : i32
    %c0_i32_0 = arith.constant 0 : i32
    %c0_i32_1 = arith.constant 0 : i32
    return %c0_i32, %c0_i32_0 : i32, i32
  }
  func.func @transform_3(%arg0: i32, %arg1: i32) -> (i32, i32) {
    %c0_i32 = arith.constant 0 : i32
    %c0_i32_0 = arith.constant 0 : i32
    return %c0_i32, %arg1 : i32, i32
  }
  func.func @transform_4(%arg0: i32, %arg1: i32) -> (i32, i32) {
    %c0_i32 = arith.constant 0 : i32
    %c0_i32_0 = arith.constant 0 : i32
    return %c0_i32, %arg1 : i32, i32
  }
  func.func @transform_5(%arg0: i32, %arg1: i32) -> (i32, i32) {
    %c0_i32 = arith.constant 0 : i32
    return %arg0, %arg1 : i32, i32
  }
}

</mosaic_0001>

<bundles_post_ra>
// kernel: tpu_custom_call.1
= control target key start
LH: loop header
LB: loop body
LE: loop exit
PB: predicated region body
PF: predicated region fallthrough
CT: control target
= control target key end

     0   :  { %10 = vsyncpa [#allocation4], 0  ;;  %s1150_s0 = inlined_call_operand.hbm [shape: f32[16,128], index: 0, kind: input, shape index: {}]   ;;  %s1151_s1 = inlined_call_operand.hbm [shape: bf16[128,512], index: 1, kind: input, shape index: {}]   ;;  %s1152_s2 = inlined_call_operand.vmem [shape: f32[1,512], index: 2, kind: input, shape index: {}]   ;;  %s1153_s3 = inlined_call_operand.hbm [shape: bf16[512,128], index: 3, kind: input, shape index: {}]   ;;  %s1154_s4 = inlined_call_operand.vmem [shape: f32[1,128], index: 4, kind: input, shape index: {}]   ;;  %s1155_s5 = inlined_call_operand.hbm [shape: f32[16,128], index: 5, kind: output, shape index: {}]  }
   0x1   :  { %11 = vsyncpa [#allocation7], 0 }
   0x2   :  { %12 = vsyncpa [#allocation5], 0  ;;  %s1049_s18 = smov [#allocation6]   ;;  %s955_s22 = scalar_lea.hbm %s1151_s1, 4096 }
   0x3   :  { %s30_s19 = sshll.u32 %s1049_s18, 4  ;;  %p956_p0 = scmp.ne.s32.totalorder %s1151_s1, %s955_s22  ;;  %s31_s19 = int_to_ptr.vmem [resolvable:$true] %s30_s19 }
   0x4   :  { %p959_p1 = scmp.lt.u32.totalorder %s955_s22, %s1151_s1 }
   0x6   :  { %p961_p2 = pnand %p959_p1, %p956_p0 }
   0x8   :  { %964 = shalt.err (!%p961_p2)
}
   0x9   :  { %s965_s27 = scalar_lea.vmem %s31_s19, 4096  ;;  %p970_p4 = scmp.lt.s32.totalorder %s31_s19, %s31_s19 }
   0xa   :  { %p966_p3 = scmp.ne.s32.totalorder %s31_s19, %s965_s27  ;;  %p971_p5 = scmp.lt.s32.totalorder %s965_s27, %s965_s27 }
   0xc   :  { %p972_p6 = por %p971_p5, %p970_p4 }
   0xe   :  { %p973_p7 = pnand %p972_p6, %p966_p3 }
  0x10   :  { %976 = shalt.err (!%p973_p7)
}
  0x11   :  { %s1050_s28 = smov 256   ;;  %s1051_s29 = smov 16  }
  0x12   :  { %36 = dma.hbm_to_vmem [thread:$0]  %s1151_s1, 4096, %s31_s19, [#allocation7], %s1050_s28, %s1050_s28, %s1051_s29  }
  0x13   :  { %s1052_s7 = smov [#allocation3]   ;;  %s977_s11 = scalar_lea.hbm %s1150_s0, 256 }
  0x14   :  { %s18_s8 = sshll.u32 %s1052_s7, 4  ;;  %p978_p8 = scmp.ne.s32.totalorder %s1150_s0, %s977_s11  ;;  %s19_s8 = int_to_ptr.vmem [resolvable:$true] %s18_s8 }
  0x15   :  { %p981_p9 = scmp.lt.u32.totalorder %s977_s11, %s1150_s0 }
  0x17   :  { %p983_p10 = pnand %p981_p9, %p978_p8 }
  0x19   :  { %986 = shalt.err (!%p983_p10)
}
  0x1a   :  { %s987_s16 = scalar_lea.vmem %s19_s8, 256  ;;  %p992_p12 = scmp.lt.s32.totalorder %s19_s8, %s19_s8 }
  0x1b   :  { %p988_p11 = scmp.ne.s32.totalorder %s19_s8, %s987_s16  ;;  %p993_p13 = scmp.lt.s32.totalorder %s987_s16, %s987_s16 }
  0x1d   :  { %p994_p0 = por %p993_p13, %p992_p12 }
  0x1f   :  { %p995_p1 = pnand %p994_p0, %p988_p11 }
  0x21   :  { %998 = shalt.err (!%p995_p1)
}
  0x22   :  { %s1053_s1 = smov 128   ;;  %s1054_s17 = smov 8  }
  0x23   :  { %24 = dma.hbm_to_vmem [thread:$0]  %s1150_s0, 256, %s19_s8, [#allocation4], %s1053_s1, %s1053_s1, %s1054_s17  }
  0x24   :  { %s1055_s20 = smov [#allocation8]   ;;  %s999_s24 = scalar_lea.hbm %s1153_s3, 4096 }
  0x25   :  { %s44_s21 = sshll.u32 %s1055_s20, 4  ;;  %p1000_p2 = scmp.ne.s32.totalorder %s1153_s3, %s999_s24  ;;  %s45_s21 = int_to_ptr.vmem [resolvable:$true] %s44_s21 }
  0x26   :  { %p1003_p3 = scmp.lt.u32.totalorder %s999_s24, %s1153_s3 }
  0x28   :  { %p1005_p4 = pnand %p1003_p3, %p1000_p2 }
  0x2a   :  { %1008 = shalt.err (!%p1005_p4)
}
  0x2b   :  { %s1009_s29 = scalar_lea.vmem %s45_s21, 4096  ;;  %p1014_p6 = scmp.lt.s32.totalorder %s45_s21, %s45_s21 }
  0x2c   :  { %p1010_p5 = scmp.ne.s32.totalorder %s45_s21, %s1009_s29  ;;  %p1015_p7 = scmp.lt.s32.totalorder %s1009_s29, %s1009_s29 }
  0x2e   :  { %p1016_p8 = por %p1015_p7, %p1014_p6 }
  0x30   :  { %p1017_p9 = pnand %p1016_p8, %p1010_p5 }
  0x32   :  { %1020 = shalt.err (!%p1017_p9)
}
  0x33   :  { %s1056_s0 = smov 64   ;;  %s1057_s30 = smov 4  }
  0x34   :  { %50 = dma.hbm_to_vmem [thread:$0]  %s1153_s3, 4096, %s45_s21, [#allocation7], %s1056_s0, %s1056_s0, %s1057_s30  }
  0x35   :  { %1043 = dma.done.wait [#allocation4], 256  }
  0x36   :  { %1044 = vsyncadd [#allocation4], 4294967040 }
  0x37   :  { %1045 = dma.done.wait [#allocation7], 8192  }
  0x38   :  { %1046 = vsyncadd [#allocation7], 4294959104  ;;  %v1058_v0 = vmov 0   ;;  %v875_v1 = vld [vmem:[#allocation6 + $0x4] ss:$16 sps:$4 sm:$0xff]   ;;  %v68_v34 = vld [vmem:[#allocation3 + $0x8] sm:$0xff] }
  0x39   :  { %316 = vmatprep.mubr.bf16.mxu0 %v1058_v0  ;;  %359 = vmatprep.mubr.bf16.mxu1 %v1058_v0  ;;  %v877_v2 = vld [vmem:[#allocation6 + $0xc] ss:$16 sps:$4 sm:$0xff]   ;;  %v879_v3 = vld [vmem:[#allocation6] ss:$16 sps:$4 sm:$0xff]   ;;  %v880_v4 = vld [vmem:[#allocation6 + $0x8] ss:$16 sps:$4 sm:$0xff]  }
  0x3a   :  { %284 = vmatprep.subr.bf16.mxu0 %v875_v1  ;;  %327 = vmatprep.subr.bf16.mxu1 %v877_v2  ;;  %v881_v5 = vld [vmem:[#allocation6 + $0x24] ss:$16 sps:$4 sm:$0xff]   ;;  %v883_v6 = vld [vmem:[#allocation6 + $0x2c] ss:$16 sps:$4 sm:$0xff]   ;;  %v885_v7 = vld [vmem:[#allocation6 + $0x20] ss:$16 sps:$4 sm:$0xff]  }
  0x3b   :  { %285 = vmatpush1.bf16.msra.mxu0 %v879_v3  ;;  %328 = vmatpush1.bf16.msra.mxu1 %v880_v4  ;;  %v886_v8 = vld [vmem:[#allocation6 + $0x28] ss:$16 sps:$4 sm:$0xff]   ;;  %v887_v9 = vld [vmem:[#allocation6 + $0x44] ss:$16 sps:$4 sm:$0xff]   ;;  %v889_v10 = vld [vmem:[#allocation6 + $0x4c] ss:$16 sps:$4 sm:$0xff]   ;;  %v104_v4 = vlaneseq }
  0x3c   :  { %286 = vmatprep.subr.bf16.mxu0 %v881_v5  ;;  %329 = vmatprep.subr.bf16.mxu1 %v883_v6  ;;  %v891_v11 = vld [vmem:[#allocation6 + $0x40] ss:$16 sps:$4 sm:$0xff]   ;;  %v892_v12 = vld [vmem:[#allocation6 + $0x48] ss:$16 sps:$4 sm:$0xff]   ;;  %v893_v13 = vld [vmem:[#allocation6 + $0x64] ss:$16 sps:$4 sm:$0xff]  }
  0x3d   :  { %v895_v14 = vld [vmem:[#allocation6 + $0x6c] ss:$16 sps:$4 sm:$0xff]   ;;  %v897_v15 = vld [vmem:[#allocation6 + $0x60] ss:$16 sps:$4 sm:$0xff]   ;;  %v898_v16 = vld [vmem:[#allocation6 + $0x68] ss:$16 sps:$4 sm:$0xff]  }
  0x3e   :  { %v899_v17 = vld [vmem:[#allocation6 + $0x84] ss:$16 sps:$4 sm:$0xff]   ;;  %v901_v18 = vld [vmem:[#allocation6 + $0x8c] ss:$16 sps:$4 sm:$0xff]   ;;  %v903_v19 = vld [vmem:[#allocation6 + $0x80] ss:$16 sps:$4 sm:$0xff]  }
  0x3f   :  { %287 = vmatpush1.bf16.msra.mxu0 %v885_v7  ;;  %330 = vmatpush1.bf16.msra.mxu1 %v886_v8  ;;  %v904_v20 = vld [vmem:[#allocation6 + $0x88] ss:$16 sps:$4 sm:$0xff]   ;;  %v905_v21 = vld [vmem:[#allocation6 + $0xa4] ss:$16 sps:$4 sm:$0xff]   ;;  %v907_v22 = vld [vmem:[#allocation6 + $0xac] ss:$16 sps:$4 sm:$0xff]  }
  0x40   :  { %288 = vmatprep.subr.bf16.mxu0 %v887_v9  ;;  %331 = vmatprep.subr.bf16.mxu1 %v889_v10  ;;  %v909_v23 = vld [vmem:[#allocation6 + $0xa0] ss:$16 sps:$4 sm:$0xff]   ;;  %v910_v24 = vld [vmem:[#allocation6 + $0xa8] ss:$16 sps:$4 sm:$0xff]   ;;  %v911_v25 = vld [vmem:[#allocation6 + $0xc4] ss:$16 sps:$4 sm:$0xff]  }
  0x41   :  { %v913_v26 = vld [vmem:[#allocation6 + $0xcc] ss:$16 sps:$4 sm:$0xff]   ;;  %v915_v27 = vld [vmem:[#allocation6 + $0xc0] ss:$16 sps:$4 sm:$0xff]   ;;  %v916_v28 = vld [vmem:[#allocation6 + $0xc8] ss:$16 sps:$4 sm:$0xff]  }
  0x42   :  { %v917_v29 = vld [vmem:[#allocation6 + $0xe4] ss:$16 sps:$4 sm:$0xff]   ;;  %v919_v30 = vld [vmem:[#allocation6 + $0xec] ss:$16 sps:$4 sm:$0xff]   ;;  %v921_v31 = vld [vmem:[#allocation6 + $0xe0] ss:$16 sps:$4 sm:$0xff]  }
  0x43   :  { %289 = vmatpush1.bf16.msra.mxu0 %v891_v11  ;;  %332 = vmatpush1.bf16.msra.mxu1 %v892_v12  ;;  %v922_v32 = vld [vmem:[#allocation6 + $0xe8] ss:$16 sps:$4 sm:$0xff]   ;;  %v67_v33 = vld [vmem:[#allocation3] sm:$0xff]  ;;  %v923_v35 = vld [vmem:[#allocation8 + $0x40] sm:$0xff]   ;;  %v105_v5 = vshrl.u32 %v104_v4, 7  ;;  %s1059_s10 = smov [#allocation9]  }
  0x44   :  { %290 = vmatprep.subr.bf16.mxu0 %v893_v13  ;;  %333 = vmatprep.subr.bf16.mxu1 %v895_v14  ;;  %v924_v36 = vld [vmem:[#allocation8 + $0xc0] sm:$0xff]   ;;  %v69_v38 = vpack.c.bf16 %v68_v34, %v67_v33  ;;  %v927_v40 = vld [vmem:[#allocation8 + $0x48] sm:$0xff]   ;;  %v931_v44 = vld [vmem:[#allocation8 + $0x50] sm:$0xff]   ;;  %s742_s11 = sshll.u32 %s1059_s10, 4  ;;  %s743_s11 = int_to_ptr.vmem [resolvable:$true] %s742_s11 }
  0x45   :  { %v925_v37 = vld [vmem:[#allocation8] sm:$0xff]   ;;  %v928_v41 = vld [vmem:[#allocation8 + $0xc8] sm:$0xff]   ;;  %v932_v45 = vld [vmem:[#allocation8 + $0xd0] sm:$0xff]   ;;  %v106_v6 = vsub.s32 0, %v105_v5  ;;  %v114_v7 = vsub.s32 2, %v105_v5  ;;  %v110_v9 = vsub.s32 1, %v105_v5  ;;  %p1026_p11 = scmp.lt.s32.totalorder %s743_s11, %s743_s11 }
  0x46   :  { %v926_v39 = vld [vmem:[#allocation8 + $0x80] sm:$0xff]   ;;  %v929_v42 = vld [vmem:[#allocation8 + $0x8] sm:$0xff]   ;;  %v933_v46 = vld [vmem:[#allocation8 + $0x10] sm:$0xff]   ;;  %v118_v10 = vsub.s32 3, %v105_v5 }
  0x47   :  { %291 = vmatpush1.bf16.msra.mxu0 %v897_v15  ;;  %334 = vmatpush1.bf16.msra.mxu1 %v898_v16  ;;  %v930_v43 = vld [vmem:[#allocation8 + $0x88] sm:$0xff]   ;;  %v934_v47 = vld [vmem:[#allocation8 + $0x90] sm:$0xff]   ;;  %v935_v48 = vld [vmem:[#allocation8 + $0x58] sm:$0xff]  }
  0x48   :  { %292 = vmatprep.subr.bf16.mxu0 %v899_v17  ;;  %335 = vmatprep.subr.bf16.mxu1 %v901_v18  ;;  %v936_v49 = vld [vmem:[#allocation8 + $0xd8] sm:$0xff]   ;;  %v939_v52 = vld [vmem:[#allocation8 + $0x60] sm:$0xff]   ;;  %v943_v56 = vld [vmem:[#allocation8 + $0x68] sm:$0xff]  }
  0x49   :  { %v937_v50 = vld [vmem:[#allocation8 + $0x18] sm:$0xff]   ;;  %v940_v53 = vld [vmem:[#allocation8 + $0xe0] sm:$0xff]   ;;  %v944_v57 = vld [vmem:[#allocation8 + $0xe8] sm:$0xff]  }
  0x4a   :  { %v938_v51 = vld [vmem:[#allocation8 + $0x98] sm:$0xff]   ;;  %v941_v54 = vld [vmem:[#allocation8 + $0x20] sm:$0xff]   ;;  %v945_v58 = vld [vmem:[#allocation8 + $0x28] sm:$0xff]  }
  0x4b   :  { %293 = vmatpush1.bf16.msra.mxu0 %v903_v19  ;;  %336 = vmatpush1.bf16.msra.mxu1 %v904_v20  ;;  %v942_v55 = vld [vmem:[#allocation8 + $0xa0] sm:$0xff]   ;;  %v946_v59 = vld [vmem:[#allocation8 + $0xa8] sm:$0xff]   ;;  %v947_v60 = vld [vmem:[#allocation8 + $0x70] sm:$0xff]  }
  0x4c   :  { %294 = vmatprep.subr.bf16.mxu0 %v905_v21  ;;  %337 = vmatprep.subr.bf16.mxu1 %v907_v22  ;;  %v948_v61 = vld [vmem:[#allocation8 + $0xf0] sm:$0xff]   ;;  %v951_v0 = vld [vmem:[#allocation8 + $0x78] sm:$0xff]  }
  0x4d   :  { %v949_v62 = vld [vmem:[#allocation8 + $0x30] sm:$0xff]   ;;  %v952_v1 = vld [vmem:[#allocation8 + $0xf8] sm:$0xff]  }
  0x4e   :  { %v950_v63 = vld [vmem:[#allocation8 + $0xb0] sm:$0xff]   ;;  %v953_v2 = vld [vmem:[#allocation8 + $0x38] sm:$0xff]  }
  0x4f   :  { %295 = vmatpush1.bf16.msra.mxu0 %v909_v23  ;;  %338 = vmatpush1.bf16.msra.mxu1 %v910_v24  ;;  %v954_v3 = vld [vmem:[#allocation8 + $0xb8] sm:$0xff]   ;;  %v102_v8 = vld [vmem:[%s1152_s2] sm:$0xf] }
  0x50   :  { %296 = vmatprep.subr.bf16.mxu0 %v911_v25  ;;  %339 = vmatprep.subr.bf16.mxu1 %v913_v26  ;;  %v107_v11 = vrot.slane %v102_v8, %v106_v6  ;;  %v115_v12 = vrot.slane %v102_v8, %v114_v7  ;;  %v111_v13 = vrot.slane %v102_v8, %v110_v9 }
  0x51   :  { %v119_v14 = vrot.slane %v102_v8, %v118_v10 }
  0x53   :  { %297 = vmatpush1.bf16.msra.mxu0 %v915_v27  ;;  %340 = vmatpush1.bf16.msra.mxu1 %v916_v28 }
  0x54   :  { %298 = vmatprep.subr.bf16.mxu0 %v917_v29  ;;  %341 = vmatprep.subr.bf16.mxu1 %v919_v30 }
  0x57   :  { %299 = vmatpush1.bf16.msra.mxu0 %v921_v31  ;;  %342 = vmatpush1.bf16.msra.mxu1 %v922_v32 }
  0x58   :  { %820 = vmatprep.subr.bf16.mxu0 %v923_v35  ;;  %842 = vmatprep.subr.bf16.mxu1 %v924_v36 }
  0x5a   :  { %317 = vmatmul.mubr.bf16.vlgmr.msra.gmra.mrb[0].mxu0 %v69_v38  ;;  %360 = vmatmul.mubr.bf16.vlgmr.msra.gmra.mrb[0].mxu1 %v69_v38 }
  0x5b   :  { %821 = vmatpush3.bf16.msra.mxu0 %v925_v37  ;;  %843 = vmatpush3.bf16.msra.mxu1 %v926_v39 }
  0x5c   :  { %822 = vmatprep.subr.bf16.mxu0 %v927_v40  ;;  %844 = vmatprep.subr.bf16.mxu1 %v928_v41 }
  0x5f   :  { %823 = vmatpush3.bf16.msra.mxu0 %v929_v42  ;;  %845 = vmatpush3.bf16.msra.mxu1 %v930_v43 }
  0x60   :  { %824 = vmatprep.subr.bf16.mxu0 %v931_v44  ;;  %846 = vmatprep.subr.bf16.mxu1 %v932_v45  ;;  %v787_v45 = vld [vmem:[%s1154_s4] ss:$0 sm:$0xff]  ;;  %s1021_s4 = scalar_lea.vmem %s743_s11, 256 }
  0x61   :  { %p1022_p10 = scmp.ne.s32.totalorder %s743_s11, %s1021_s4  ;;  %p1027_p12 = scmp.lt.s32.totalorder %s1021_s4, %s1021_s4 }
  0x63   :  { %825 = vmatpush3.bf16.msra.mxu0 %v933_v46  ;;  %847 = vmatpush3.bf16.msra.mxu1 %v934_v47  ;;  %p1028_p13 = por %p1027_p12, %p1026_p11 }
  0x64   :  { %826 = vmatprep.subr.bf16.mxu0 %v935_v48  ;;  %848 = vmatprep.subr.bf16.mxu1 %v936_v49 }
  0x65   :  { %p1029_p0 = pnand %p1028_p13, %p1022_p10 }
  0x67   :  { %827 = vmatpush3.bf16.msra.mxu0 %v937_v50  ;;  %849 = vmatpush3.bf16.msra.mxu1 %v938_v51 }
  0x68   :  { %828 = vmatprep.subr.bf16.mxu0 %v939_v52  ;;  %850 = vmatprep.subr.bf16.mxu1 %v940_v53 }
  0x6b   :  { %829 = vmatpush3.bf16.msra.mxu0 %v941_v54  ;;  %851 = vmatpush3.bf16.msra.mxu1 %v942_v55 }
  0x6c   :  { %830 = vmatprep.subr.bf16.mxu0 %v943_v56  ;;  %852 = vmatprep.subr.bf16.mxu1 %v944_v57 }
  0x6f   :  { %831 = vmatpush3.bf16.msra.mxu0 %v945_v58  ;;  %853 = vmatpush3.bf16.msra.mxu1 %v946_v59 }
  0x70   :  { %832 = vmatprep.subr.bf16.mxu0 %v947_v60  ;;  %854 = vmatprep.subr.bf16.mxu1 %v948_v61 }
  0x73   :  { %833 = vmatpush3.bf16.msra.mxu0 %v949_v62  ;;  %855 = vmatpush3.bf16.msra.mxu1 %v950_v63 }
  0x74   :  { %834 = vmatprep.subr.bf16.mxu0 %v951_v0  ;;  %856 = vmatprep.subr.bf16.mxu1 %v952_v1 }
  0x77   :  { %835 = vmatpush3.bf16.msra.mxu0 %v953_v2  ;;  %857 = vmatpush3.bf16.msra.mxu1 %v954_v3 }
 0x12d   :  { %v318_v15 = vpop.f32.mrb[0].mxu0  ;;  %v361_v16 = vpop.f32.mrb[0].mxu1 }
 0x12e   :  { %v319_v17 = vadd.f32 %v318_v15, %v107_v11  ;;  %v362_v18 = vadd.f32 %v361_v16, %v115_v12  ;;  %v320_v19 = vpop.f32.mrb[1].mxu0  ;;  %v363_v20 = vpop.f32.mrb[1].mxu1 }
 0x12f   :  { %v321_v21 = vadd.f32 %v320_v19, %v111_v13  ;;  %v364_v22 = vadd.f32 %v363_v20, %v119_v14  ;;  %v322_v23 = vpop.f32.mrb[2].mxu0  ;;  %v365_v24 = vpop.f32.mrb[2].mxu1 }
 0x130   :  { %v372_v25 = vmax.f32 %v362_v18, 0.0  ;;  %v323_v26 = vadd.f32 %v322_v23, %v107_v11  ;;  %v366_v27 = vadd.f32 %v365_v24, %v115_v12  ;;  %v324_v28 = vpop.f32.mrb[3].mxu0  ;;  %v367_v29 = vpop.f32.mrb[3].mxu1  ;;  %v370_v33 = vmax.f32 %v319_v17, 0.0 }
 0x131   :  { %v373_v30 = vmax.f32 %v364_v22, 0.0  ;;  %v325_v31 = vadd.f32 %v324_v28, %v111_v13  ;;  %v368_v32 = vadd.f32 %v367_v29, %v119_v14  ;;  %v371_v36 = vmax.f32 %v321_v21, 0.0 }
 0x132   :  { %v374_v34 = vmax.f32 %v323_v26, 0.0  ;;  %v376_v35 = vmax.f32 %v366_v27, 0.0 }
 0x133   :  { %v375_v37 = vmax.f32 %v325_v31, 0.0  ;;  %v377_v38 = vmax.f32 %v368_v32, 0.0 }
 0x134   :  { %v378_v39 = vpack.c.bf16 %v374_v34, %v370_v33  ;;  %v380_v40 = vpack.c.bf16 %v376_v35, %v372_v25 }
 0x135   :  { %v379_v41 = vpack.c.bf16 %v375_v37, %v371_v36  ;;  %v381_v42 = vpack.c.bf16 %v377_v38, %v373_v30 }
 0x137   :  { %685 = vmatprep.mubr.bf16.mxu0 %v379_v41  ;;  %726 = vmatprep.mubr.bf16.mxu1 %v381_v42 }
 0x138   :  { %686 = vmatmul.mubr.bf16.vlgmr.msra.gmra.mrb[4].mxu0 %v378_v39  ;;  %727 = vmatmul.mubr.bf16.vlgmr.msra.gmra.mrb[4].mxu1 %v380_v40 }
 0x20b   :  { %v836_v43 = vpop.f32.mrb[4].mxu0  ;;  %v858_v44 = vpop.f32.mrb[4].mxu1 }
 0x20c   :  { %v837_v46 = vpop.f32.mrb[5].mxu0  ;;  %v859_v47 = vpop.f32.mrb[5].mxu1 }
 0x20d   :  { %v838_v48 = vadd.f32 %v837_v46, %v836_v43  ;;  %v860_v49 = vadd.f32 %v859_v47, %v858_v44  ;;  %v839_v50 = vpop.f32.mrb[6].mxu0  ;;  %v861_v51 = vpop.f32.mrb[6].mxu1 }
 0x20e   :  { %v840_v52 = vpop.f32.mrb[7].mxu0  ;;  %v862_v53 = vpop.f32.mrb[7].mxu1 }
 0x20f   :  { %v688_v54 = vadd.f32 %v838_v48, %v787_v45  ;;  %v841_v55 = vadd.f32 %v840_v52, %v839_v50  ;;  %v863_v56 = vadd.f32 %v862_v53, %v861_v51 }
 0x211   :  { %v729_v57 = vadd.f32 %v860_v49, %v688_v54  ;;  %v691_v58 = vadd.f32 %v841_v55, %v787_v45 }
 0x213   :  { %735 = vst [vmem:[#allocation9] sm:$0xff] %v729_v57  ;;  %v732_v59 = vadd.f32 %v863_v56, %v691_v58 }
 0x215   :  { %736 = vst [vmem:[#allocation9 + $0x8] sm:$0xff] %v732_v59 }
 0x216   :  { %1032 = shalt.err (!%p1029_p0)
}
 0x217   :  { %s1033_s14 = scalar_lea.hbm %s1155_s5, 256 }
 0x218   :  { %p1034_p1 = scmp.ne.s32.totalorder %s1155_s5, %s1033_s14  ;;  %p1037_p2 = scmp.lt.u32.totalorder %s1033_s14, %s1155_s5 }
 0x21a   :  { %p1039_p3 = pnand %p1037_p2, %p1034_p1 }
 0x21c   :  { %1042 = shalt.err (!%p1039_p3)
}
 0x21d   :  { %748 = dma.vmem_to_hbm [thread:$0]  %s743_s11, 256, %s1155_s5, [#allocation5], %s1053_s1, %s1053_s1, %s1054_s17  }
 0x21e   :  { %1047 = dma.done.wait [#allocation5], 256  }
 0x21f   :  { %1048 = vsyncadd [#allocation5], 4294967040 }
 0x220   :  { %752 = vsyncpa [#allocation4], 1 }
 0x221   :  { %753 = vsyncpa [#allocation7], 1 }
 0x222   :  { %754 = vsyncpa [#allocation5], 1 }

// kernel: tpu_custom_call.1
= control target key start
LH: loop header
LB: loop body
LE: loop exit
PB: predicated region body
PF: predicated region fallthrough
CT: control target
= control target key end

     0   :  { %10 = vsyncpa [#allocation4], 0  ;;  %s1150_s0 = inlined_call_operand.hbm [shape: f32[16,128], index: 0, kind: input, shape index: {}]   ;;  %s1151_s1 = inlined_call_operand.hbm [shape: bf16[128,512], index: 1, kind: input, shape index: {}]   ;;  %s1152_s2 = inlined_call_operand.vmem [shape: f32[1,512], index: 2, kind: input, shape index: {}]   ;;  %s1153_s3 = inlined_call_operand.hbm [shape: bf16[512,128], index: 3, kind: input, shape index: {}]   ;;  %s1154_s4 = inlined_call_operand.vmem [shape: f32[1,128], index: 4, kind: input, shape index: {}]   ;;  %s1155_s5 = inlined_call_operand.hbm [shape: f32[16,128], index: 5, kind: output, shape index: {}]  }
   0x1   :  { %11 = vsyncpa [#allocation7], 0 }
   0x2   :  { %12 = vsyncpa [#allocation5], 0  ;;  %s1049_s18 = smov [#allocation6]   ;;  %s955_s22 = scalar_lea.hbm %s1151_s1, 4096 }
   0x3   :  { %s30_s19 = sshll.u32 %s1049_s18, 4  ;;  %p956_p0 = scmp.ne.s32.totalorder %s1151_s1, %s955_s22  ;;  %s31_s19 = int_to_ptr.vmem [resolvable:$true] %s30_s19 }
   0x4   :  { %p959_p1 = scmp.lt.u32.totalorder %s955_s22, %s1151_s1 }
   0x6   :  { %p961_p2 = pnand %p959_p1, %p956_p0 }
   0x8   :  { %964 = shalt.err (!%p961_p2)
}
   0x9   :  { %s965_s27 = scalar_lea.vmem %s31_s19, 4096  ;;  %p970_p4 = scmp.lt.s32.totalorder %s31_s19, %s31_s19 }
   0xa   :  { %p966_p3 = scmp.ne.s32.totalorder %s31_s19, %s965_s27  ;;  %p971_p5 = scmp.lt.s32.totalorder %s965_s27, %s965_s27 }
   0xc   :  { %p972_p6 = por %p971_p5, %p970_p4 }
   0xe   :  { %p973_p7 = pnand %p972_p6, %p966_p3 }
  0x10   :  { %976 = shalt.err (!%p973_p7)
}
  0x11   :  { %s1050_s28 = smov 256   ;;  %s1051_s29 = smov 16  }
  0x12   :  { %36 = dma.hbm_to_vmem [thread:$0]  %s1151_s1, 4096, %s31_s19, [#allocation7], %s1050_s28, %s1050_s28, %s1051_s29  }
  0x13   :  { %s1052_s7 = smov [#allocation3]   ;;  %s977_s11 = scalar_lea.hbm %s1150_s0, 256 }
  0x14   :  { %s18_s8 = sshll.u32 %s1052_s7, 4  ;;  %p978_p8 = scmp.ne.s32.totalorder %s1150_s0, %s977_s11  ;;  %s19_s8 = int_to_ptr.vmem [resolvable:$true] %s18_s8 }
  0x15   :  { %p981_p9 = scmp.lt.u32.totalorder %s977_s11, %s1150_s0 }
  0x17   :  { %p983_p10 = pnand %p981_p9, %p978_p8 }
  0x19   :  { %986 = shalt.err (!%p983_p10)
}
  0x1a   :  { %s987_s16 = scalar_lea.vmem %s19_s8, 256  ;;  %p992_p12 = scmp.lt.s32.totalorder %s19_s8, %s19_s8 }
  0x1b   :  { %p988_p11 = scmp.ne.s32.totalorder %s19_s8, %s987_s16  ;;  %p993_p13 = scmp.lt.s32.totalorder %s987_s16, %s987_s16 }
  0x1d   :  { %p994_p0 = por %p993_p13, %p992_p12 }
  0x1f   :  { %p995_p1 = pnand %p994_p0, %p988_p11 }
  0x21   :  { %998 = shalt.err (!%p995_p1)
}
  0x22   :  { %s1053_s1 = smov 128   ;;  %s1054_s17 = smov 8  }
  0x23   :  { %24 = dma.hbm_to_vmem [thread:$0]  %s1150_s0, 256, %s19_s8, [#allocation4], %s1053_s1, %s1053_s1, %s1054_s17  }
  0x24   :  { %s1055_s20 = smov [#allocation8]   ;;  %s999_s24 = scalar_lea.hbm %s1153_s3, 4096 }
  0x25   :  { %s44_s21 = sshll.u32 %s1055_s20, 4  ;;  %p1000_p2 = scmp.ne.s32.totalorder %s1153_s3, %s999_s24  ;;  %s45_s21 = int_to_ptr.vmem [resolvable:$true] %s44_s21 }
  0x26   :  { %p1003_p3 = scmp.lt.u32.totalorder %s999_s24, %s1153_s3 }
  0x28   :  { %p1005_p4 = pnand %p1003_p3, %p1000_p2 }
  0x2a   :  { %1008 = shalt.err (!%p1005_p4)
}
  0x2b   :  { %s1009_s29 = scalar_lea.vmem %s45_s21, 4096  ;;  %p1014_p6 = scmp.lt.s32.totalorder %s45_s21, %s45_s21 }
  0x2c   :  { %p1010_p5 = scmp.ne.s32.totalorder %s45_s21, %s1009_s29  ;;  %p1015_p7 = scmp.lt.s32.totalorder %s1009_s29, %s1009_s29 }
  0x2e   :  { %p1016_p8 = por %p1015_p7, %p1014_p6 }
  0x30   :  { %p1017_p9 = pnand %p1016_p8, %p1010_p5 }
  0x32   :  { %1020 = shalt.err (!%p1017_p9)
}
  0x33   :  { %s1056_s0 = smov 64   ;;  %s1057_s30 = smov 4  }
  0x34   :  { %50 = dma.hbm_to_vmem [thread:$0]  %s1153_s3, 4096, %s45_s21, [#allocation7], %s1056_s0, %s1056_s0, %s1057_s30  }
  0x35   :  { %1043 = dma.done.wait [#allocation4], 256  }
  0x36   :  { %1044 = vsyncadd [#allocation4], 4294967040 }
  0x37   :  { %1045 = dma.done.wait [#allocation7], 8192  }
  0x38   :  { %1046 = vsyncadd [#allocation7], 4294959104  ;;  %v1058_v0 = vmov 0   ;;  %v875_v1 = vld [vmem:[#allocation6 + $0x4] ss:$16 sps:$4 sm:$0xff]   ;;  %v68_v34 = vld [vmem:[#allocation3 + $0x8] sm:$0xff] }
  0x39   :  { %316 = vmatprep.mubr.bf16.mxu0 %v1058_v0  ;;  %359 = vmatprep.mubr.bf16.mxu1 %v1058_v0  ;;  %v877_v2 = vld [vmem:[#allocation6 + $0xc] ss:$16 sps:$4 sm:$0xff]   ;;  %v879_v3 = vld [vmem:[#allocation6] ss:$16 sps:$4 sm:$0xff]   ;;  %v880_v4 = vld [vmem:[#allocation6 + $0x8] ss:$16 sps:$4 sm:$0xff]  }
  0x3a   :  { %284 = vmatprep.subr.bf16.mxu0 %v875_v1  ;;  %327 = vmatprep.subr.bf16.mxu1 %v877_v2  ;;  %v881_v5 = vld [vmem:[#allocation6 + $0x24] ss:$16 sps:$4 sm:$0xff]   ;;  %v883_v6 = vld [vmem:[#allocation6 + $0x2c] ss:$16 sps:$4 sm:$0xff]   ;;  %v885_v7 = vld [vmem:[#allocation6 + $0x20] ss:$16 sps:$4 sm:$0xff]  }
  0x3b   :  { %285 = vmatpush1.bf16.msra.mxu0 %v879_v3  ;;  %328 = vmatpush1.bf16.msra.mxu1 %v880_v4  ;;  %v886_v8 = vld [vmem:[#allocation6 + $0x28] ss:$16 sps:$4 sm:$0xff]   ;;  %v887_v9 = vld [vmem:[#allocation6 + $0x44] ss:$16 sps:$4 sm:$0xff]   ;;  %v889_v10 = vld [vmem:[#allocation6 + $0x4c] ss:$16 sps:$4 sm:$0xff]   ;;  %v104_v4 = vlaneseq }
  0x3c   :  { %286 = vmatprep.subr.bf16.mxu0 %v881_v5  ;;  %329 = vmatprep.subr.bf16.mxu1 %v883_v6  ;;  %v891_v11 = vld [vmem:[#allocation6 + $0x40] ss:$16 sps:$4 sm:$0xff]   ;;  %v892_v12 = vld [vmem:[#allocation6 + $0x48] ss:$16 sps:$4 sm:$0xff]   ;;  %v893_v13 = vld [vmem:[#allocation6 + $0x64] ss:$16 sps:$4 sm:$0xff]  }
  0x3d   :  { %v895_v14 = vld [vmem:[#allocation6 + $0x6c] ss:$16 sps:$4 sm:$0xff]   ;;  %v897_v15 = vld [vmem:[#allocation6 + $0x60] ss:$16 sps:$4 sm:$0xff]   ;;  %v898_v16 = vld [vmem:[#allocation6 + $0x68] ss:$16 sps:$4 sm:$0xff]  }
  0x3e   :  { %v899_v17 = vld [vmem:[#allocation6 + $0x84] ss:$16 sps:$4 sm:$0xff]   ;;  %v901_v18 = vld [vmem:[#allocation6 + $0x8c] ss:$16 sps:$4 sm:$0xff]   ;;  %v903_v19 = vld [vmem:[#allocation6 + $0x80] ss:$16 sps:$4 sm:$0xff]  }
  0x3f   :  { %287 = vmatpush1.bf16.msra.mxu0 %v885_v7  ;;  %330 = vmatpush1.bf16.msra.mxu1 %v886_v8  ;;  %v904_v20 = vld [vmem:[#allocation6 + $0x88] ss:$16 sps:$4 sm:$0xff]   ;;  %v905_v21 = vld [vmem:[#allocation6 + $0xa4] ss:$16 sps:$4 sm:$0xff]   ;;  %v907_v22 = vld [vmem:[#allocation6 + $0xac] ss:$16 sps:$4 sm:$0xff]  }
  0x40   :  { %288 = vmatprep.subr.bf16.mxu0 %v887_v9  ;;  %331 = vmatprep.subr.bf16.mxu1 %v889_v10  ;;  %v909_v23 = vld [vmem:[#allocation6 + $0xa0] ss:$16 sps:$4 sm:$0xff]   ;;  %v910_v24 = vld [vmem:[#allocation6 + $0xa8] ss:$16 sps:$4 sm:$0xff]   ;;  %v911_v25 = vld [vmem:[#allocation6 + $0xc4] ss:$16 sps:$4 sm:$0xff]  }
  0x41   :  { %v913_v26 = vld [vmem:[#allocation6 + $0xcc] ss:$16 sps:$4 sm:$0xff]   ;;  %v915_v27 = vld [vmem:[#allocation6 + $0xc0] ss:$16 sps:$4 sm:$0xff]   ;;  %v916_v28 = vld [vmem:[#allocation6 + $0xc8] ss:$16 sps:$4 sm:$0xff]  }
  0x42   :  { %v917_v29 = vld [vmem:[#allocation6 + $0xe4] ss:$16 sps:$4 sm:$0xff]   ;;  %v919_v30 = vld [vmem:[#allocation6 + $0xec] ss:$16 sps:$4 sm:$0xff]   ;;  %v921_v31 = vld [vmem:[#allocation6 + $0xe0] ss:$16 sps:$4 sm:$0xff]  }
  0x43   :  { %289 = vmatpush1.bf16.msra.mxu0 %v891_v11  ;;  %332 = vmatpush1.bf16.msra.mxu1 %v892_v12  ;;  %v922_v32 = vld [vmem:[#allocation6 + $0xe8] ss:$16 sps:$4 sm:$0xff]   ;;  %v67_v33 = vld [vmem:[#allocation3] sm:$0xff]  ;;  %v923_v35 = vld [vmem:[#allocation8 + $0x40] sm:$0xff]   ;;  %v105_v5 = vshrl.u32 %v104_v4, 7  ;;  %s1059_s10 = smov [#allocation9]  }
  0x44   :  { %290 = vmatprep.subr.bf16.mxu0 %v893_v13  ;;  %333 = vmatprep.subr.bf16.mxu1 %v895_v14  ;;  %v924_v36 = vld [vmem:[#allocation8 + $0xc0] sm:$0xff]   ;;  %v69_v38 = vpack.c.bf16 %v68_v34, %v67_v33  ;;  %v927_v40 = vld [vmem:[#allocation8 + $0x48] sm:$0xff]   ;;  %v931_v44 = vld [vmem:[#allocation8 + $0x50] sm:$0xff]   ;;  %s742_s11 = sshll.u32 %s1059_s10, 4  ;;  %s743_s11 = int_to_ptr.vmem [resolvable:$true] %s742_s11 }
  0x45   :  { %v925_v37 = vld [vmem:[#allocation8] sm:$0xff]   ;;  %v928_v41 = vld [vmem:[#allocation8 + $0xc8] sm:$0xff]   ;;  %v932_v45 = vld [vmem:[#allocation8 + $0xd0] sm:$0xff]   ;;  %v106_v6 = vsub.s32 0, %v105_v5  ;;  %v114_v7 = vsub.s32 2, %v105_v5  ;;  %v110_v9 = vsub.s32 1, %v105_v5  ;;  %p1026_p11 = scmp.lt.s32.totalorder %s743_s11, %s743_s11 }
  0x46   :  { %v926_v39 = vld [vmem:[#allocation8 + $0x80] sm:$0xff]   ;;  %v929_v42 = vld [vmem:[#allocation8 + $0x8] sm:$0xff]   ;;  %v933_v46 = vld [vmem:[#allocation8 + $0x10] sm:$0xff]   ;;  %v118_v10 = vsub.s32 3, %v105_v5 }
  0x47   :  { %291 = vmatpush1.bf16.msra.mxu0 %v897_v15  ;;  %334 = vmatpush1.bf16.msra.mxu1 %v898_v16  ;;  %v930_v43 = vld [vmem:[#allocation8 + $0x88] sm:$0xff]   ;;  %v934_v47 = vld [vmem:[#allocation8 + $0x90] sm:$0xff]   ;;  %v935_v48 = vld [vmem:[#allocation8 + $0x58] sm:$0xff]  }
  0x48   :  { %292 = vmatprep.subr.bf16.mxu0 %v899_v17  ;;  %335 = vmatprep.subr.bf16.mxu1 %v901_v18  ;;  %v936_v49 = vld [vmem:[#allocation8 + $0xd8] sm:$0xff]   ;;  %v939_v52 = vld [vmem:[#allocation8 + $0x60] sm:$0xff]   ;;  %v943_v56 = vld [vmem:[#allocation8 + $0x68] sm:$0xff]  }
  0x49   :  { %v937_v50 = vld [vmem:[#allocation8 + $0x18] sm:$0xff]   ;;  %v940_v53 = vld [vmem:[#allocation8 + $0xe0] sm:$0xff]   ;;  %v944_v57 = vld [vmem:[#allocation8 + $0xe8] sm:$0xff]  }
  0x4a   :  { %v938_v51 = vld [vmem:[#allocation8 + $0x98] sm:$0xff]   ;;  %v941_v54 = vld [vmem:[#allocation8 + $0x20] sm:$0xff]   ;;  %v945_v58 = vld [vmem:[#allocation8 + $0x28] sm:$0xff]  }
  0x4b   :  { %293 = vmatpush1.bf16.msra.mxu0 %v903_v19  ;;  %336 = vmatpush1.bf16.msra.mxu1 %v904_v20  ;;  %v942_v55 = vld [vmem:[#allocation8 + $0xa0] sm:$0xff]   ;;  %v946_v59 = vld [vmem:[#allocation8 + $0xa8] sm:$0xff]   ;;  %v947_v60 = vld [vmem:[#allocation8 + $0x70] sm:$0xff]  }
  0x4c   :  { %294 = vmatprep.subr.bf16.mxu0 %v905_v21  ;;  %337 = vmatprep.subr.bf16.mxu1 %v907_v22  ;;  %v948_v61 = vld [vmem:[#allocation8 + $0xf0] sm:$0xff]   ;;  %v951_v0 = vld [vmem:[#allocation8 + $0x78] sm:$0xff]  }
  0x4d   :  { %v949_v62 = vld [vmem:[#allocation8 + $0x30] sm:$0xff]   ;;  %v952_v1 = vld [vmem:[#allocation8 + $0xf8] sm:$0xff]  }
  0x4e   :  { %v950_v63 = vld [vmem:[#allocation8 + $0xb0] sm:$0xff]   ;;  %v953_v2 = vld [vmem:[#allocation8 + $0x38] sm:$0xff]  }
  0x4f   :  { %295 = vmatpush1.bf16.msra.mxu0 %v909_v23  ;;  %338 = vmatpush1.bf16.msra.mxu1 %v910_v24  ;;  %v954_v3 = vld [vmem:[#allocation8 + $0xb8] sm:$0xff]   ;;  %v102_v8 = vld [vmem:[%s1152_s2] sm:$0xf] }
  0x50   :  { %296 = vmatprep.subr.bf16.mxu0 %v911_v25  ;;  %339 = vmatprep.subr.bf16.mxu1 %v913_v26  ;;  %v107_v11 = vrot.slane %v102_v8, %v106_v6  ;;  %v115_v12 = vrot.slane %v102_v8, %v114_v7  ;;  %v111_v13 = vrot.slane %v102_v8, %v110_v9 }
  0x51   :  { %v119_v14 = vrot.slane %v102_v8, %v118_v10 }
  0x53   :  { %297 = vmatpush1.bf16.msra.mxu0 %v915_v27  ;;  %340 = vmatpush1.bf16.msra.mxu1 %v916_v28 }
  0x54   :  { %298 = vmatprep.subr.bf16.mxu0 %v917_v29  ;;  %341 = vmatprep.subr.bf16.mxu1 %v919_v30 }
  0x57   :  { %299 = vmatpush1.bf16.msra.mxu0 %v921_v31  ;;  %342 = vmatpush1.bf16.msra.mxu1 %v922_v32 }
  0x58   :  { %820 = vmatprep.subr.bf16.mxu0 %v923_v35  ;;  %842 = vmatprep.subr.bf16.mxu1 %v924_v36 }
  0x5a   :  { %317 = vmatmul.mubr.bf16.vlgmr.msra.gmra.mrb[0].mxu0 %v69_v38  ;;  %360 = vmatmul.mubr.bf16.vlgmr.msra.gmra.mrb[0].mxu1 %v69_v38 }
  0x5b   :  { %821 = vmatpush3.bf16.msra.mxu0 %v925_v37  ;;  %843 = vmatpush3.bf16.msra.mxu1 %v926_v39 }
  0x5c   :  { %822 = vmatprep.subr.bf16.mxu0 %v927_v40  ;;  %844 = vmatprep.subr.bf16.mxu1 %v928_v41 }
  0x5f   :  { %823 = vmatpush3.bf16.msra.mxu0 %v929_v42  ;;  %845 = vmatpush3.bf16.msra.mxu1 %v930_v43 }
  0x60   :  { %824 = vmatprep.subr.bf16.mxu0 %v931_v44  ;;  %846 = vmatprep.subr.bf16.mxu1 %v932_v45  ;;  %v787_v45 = vld [vmem:[%s1154_s4] ss:$0 sm:$0xff]  ;;  %s1021_s4 = scalar_lea.vmem %s743_s11, 256 }
  0x61   :  { %p1022_p10 = scmp.ne.s32.totalorder %s743_s11, %s1021_s4  ;;  %p1027_p12 = scmp.lt.s32.totalorder %s1021_s4, %s1021_s4 }
  0x63   :  { %825 = vmatpush3.bf16.msra.mxu0 %v933_v46  ;;  %847 = vmatpush3.bf16.msra.mxu1 %v934_v47  ;;  %p1028_p13 = por %p1027_p12, %p1026_p11 }
  0x64   :  { %826 = vmatprep.subr.bf16.mxu0 %v935_v48  ;;  %848 = vmatprep.subr.bf16.mxu1 %v936_v49 }
  0x65   :  { %p1029_p0 = pnand %p1028_p13, %p1022_p10 }
  0x67   :  { %827 = vmatpush3.bf16.msra.mxu0 %v937_v50  ;;  %849 = vmatpush3.bf16.msra.mxu1 %v938_v51 }
  0x68   :  { %828 = vmatprep.subr.bf16.mxu0 %v939_v52  ;;  %850 = vmatprep.subr.bf16.mxu1 %v940_v53 }
  0x6b   :  { %829 = vmatpush3.bf16.msra.mxu0 %v941_v54  ;;  %851 = vmatpush3.bf16.msra.mxu1 %v942_v55 }
  0x6c   :  { %830 = vmatprep.subr.bf16.mxu0 %v943_v56  ;;  %852 = vmatprep.subr.bf16.mxu1 %v944_v57 }
  0x6f   :  { %831 = vmatpush3.bf16.msra.mxu0 %v945_v58  ;;  %853 = vmatpush3.bf16.msra.mxu1 %v946_v59 }
  0x70   :  { %832 = vmatprep.subr.bf16.mxu0 %v947_v60  ;;  %854 = vmatprep.subr.bf16.mxu1 %v948_v61 }
  0x73   :  { %833 = vmatpush3.bf16.msra.mxu0 %v949_v62  ;;  %855 = vmatpush3.bf16.msra.mxu1 %v950_v63 }
  0x74   :  { %834 = vmatprep.subr.bf16.mxu0 %v951_v0  ;;  %856 = vmatprep.subr.bf16.mxu1 %v952_v1 }
  0x77   :  { %835 = vmatpush3.bf16.msra.mxu0 %v953_v2  ;;  %857 = vmatpush3.bf16.msra.mxu1 %v954_v3 }
 0x12d   :  { %v318_v15 = vpop.f32.mrb[0].mxu0  ;;  %v361_v16 = vpop.f32.mrb[0].mxu1 }
 0x12e   :  { %v319_v17 = vadd.f32 %v318_v15, %v107_v11  ;;  %v362_v18 = vadd.f32 %v361_v16, %v115_v12  ;;  %v320_v19 = vpop.f32.mrb[1].mxu0  ;;  %v363_v20 = vpop.f32.mrb[1].mxu1 }
 0x12f   :  { %v321_v21 = vadd.f32 %v320_v19, %v111_v13  ;;  %v364_v22 = vadd.f32 %v363_v20, %v119_v14  ;;  %v322_v23 = vpop.f32.mrb[2].mxu0  ;;  %v365_v24 = vpop.f32.mrb[2].mxu1 }
 0x130   :  { %v372_v25 = vmax.f32 %v362_v18, 0.0  ;;  %v323_v26 = vadd.f32 %v322_v23, %v107_v11  ;;  %v366_v27 = vadd.f32 %v365_v24, %v115_v12  ;;  %v324_v28 = vpop.f32.mrb[3].mxu0  ;;  %v367_v29 = vpop.f32.mrb[3].mxu1  ;;  %v370_v33 = vmax.f32 %v319_v17, 0.0 }
 0x131   :  { %v373_v30 = vmax.f32 %v364_v22, 0.0  ;;  %v325_v31 = vadd.f32 %v324_v28, %v111_v13  ;;  %v368_v32 = vadd.f32 %v367_v29, %v119_v14  ;;  %v371_v36 = vmax.f32 %v321_v21, 0.0 }
 0x132   :  { %v374_v34 = vmax.f32 %v323_v26, 0.0  ;;  %v376_v35 = vmax.f32 %v366_v27, 0.0 }
 0x133   :  { %v375_v37 = vmax.f32 %v325_v31, 0.0  ;;  %v377_v38 = vmax.f32 %v368_v32, 0.0 }
 0x134   :  { %v378_v39 = vpack.c.bf16 %v374_v34, %v370_v33  ;;  %v380_v40 = vpack.c.bf16 %v376_v35, %v372_v25 }
 0x135   :  { %v379_v41 = vpack.c.bf16 %v375_v37, %v371_v36  ;;  %v381_v42 = vpack.c.bf16 %v377_v38, %v373_v30 }
 0x137   :  { %685 = vmatprep.mubr.bf16.mxu0 %v379_v41  ;;  %726 = vmatprep.mubr.bf16.mxu1 %v381_v42 }
 0x138   :  { %686 = vmatmul.mubr.bf16.vlgmr.msra.gmra.mrb[4].mxu0 %v378_v39  ;;  %727 = vmatmul.mubr.bf16.vlgmr.msra.gmra.mrb[4].mxu1 %v380_v40 }
 0x20b   :  { %v836_v43 = vpop.f32.mrb[4].mxu0  ;;  %v858_v44 = vpop.f32.mrb[4].mxu1 }
 0x20c   :  { %v837_v46 = vpop.f32.mrb[5].mxu0  ;;  %v859_v47 = vpop.f32.mrb[5].mxu1 }
 0x20d   :  { %v838_v48 = vadd.f32 %v837_v46, %v836_v43  ;;  %v860_v49 = vadd.f32 %v859_v47, %v858_v44  ;;  %v839_v50 = vpop.f32.mrb[6].mxu0  ;;  %v861_v51 = vpop.f32.mrb[6].mxu1 }
 0x20e   :  { %v840_v52 = vpop.f32.mrb[7].mxu0  ;;  %v862_v53 = vpop.f32.mrb[7].mxu1 }
 0x20f   :  { %v688_v54 = vadd.f32 %v838_v48, %v787_v45  ;;  %v841_v55 = vadd.f32 %v840_v52, %v839_v50  ;;  %v863_v56 = vadd.f32 %v862_v53, %v861_v51 }
 0x211   :  { %v729_v57 = vadd.f32 %v860_v49, %v688_v54  ;;  %v691_v58 = vadd.f32 %v841_v55, %v787_v45 }
 0x213   :  { %735 = vst [vmem:[#allocation9] sm:$0xff] %v729_v57  ;;  %v732_v59 = vadd.f32 %v863_v56, %v691_v58 }
 0x215   :  { %736 = vst [vmem:[#allocation9 + $0x8] sm:$0xff] %v732_v59 }
 0x216   :  { %1032 = shalt.err (!%p1029_p0)
}
 0x217   :  { %s1033_s14 = scalar_lea.hbm %s1155_s5, 256 }
 0x218   :  { %p1034_p1 = scmp.ne.s32.totalorder %s1155_s5, %s1033_s14  ;;  %p1037_p2 = scmp.lt.u32.totalorder %s1033_s14, %s1155_s5 }
 0x21a   :  { %p1039_p3 = pnand %p1037_p2, %p1034_p1 }
 0x21c   :  { %1042 = shalt.err (!%p1039_p3)
}
 0x21d   :  { %748 = dma.vmem_to_hbm [thread:$0]  %s743_s11, 256, %s1155_s5, [#allocation5], %s1053_s1, %s1053_s1, %s1054_s17  }
 0x21e   :  { %1047 = dma.done.wait [#allocation5], 256  }
 0x21f   :  { %1048 = vsyncadd [#allocation5], 4294967040 }
 0x220   :  { %752 = vsyncpa [#allocation4], 1 }
 0x221   :  { %753 = vsyncpa [#allocation7], 1 }
 0x222   :  { %754 = vsyncpa [#allocation5], 1 }

</bundles_post_ra>
